<compile_context>
chip_gen: v7x
topology: tpu7x:2x2x1
jax: 0.10.0
libtpu: 0.0.40
codegen_flags: <defaults>
</compile_context>

<pallas_src>
import numpy as np
import jax
import jax.numpy as jnp
from jax.experimental import pallas as pl
from jax.experimental.pallas import tpu as pltpu

# ---------------- model hyper-parameters (small, consistent with the module) ----
FEAT_DIM = 64                 # args.feature_size
EMBED_DIM = FEAT_DIM // 2
N_CLASS = 4                   # args.num_class  -> classifier outputs N_CLASS + 1
ROI_SIZE = 12                 # args.roi_size (divisible by 6, as in SEAL configs)
MAX_PROPOSAL = 20             # args.max_proposal
HEAD_LANES = 128              # lane width of the packed head / output slab
MAX_TILE_N = 512              # row tile (review: 256-1024; v7x VMEM-safe)


# ======================= glue: exact 1-D roi_align (vectorized NumPy) ==========
def _roi_align_1d_batch(feat, y1, y2, pooled):
    """Vectorized torchvision.ops.roi_align (aligned=False, sampling_ratio=-1)
    for a [H, D] 'image' of width 1 and boxes spanning the full width."""
    feat = np.asarray(feat)
    H, D = feat.shape
    y1 = np.asarray(y1, dtype=np.float64)
    y2 = np.asarray(y2, dtype=np.float64)
    M = y1.shape[0]

    roi_h = np.maximum(y2 - y1, 1.0)                                  # [M]
    bin_size = roi_h / pooled                                         # [M]
    grid = np.maximum(np.ceil(roi_h / pooled), 1.0).astype(np.int64)  # [M]
    gmax = int(grid.max())

    ph = np.arange(pooled, dtype=np.float64)                          # [R]
    iy = np.arange(gmax, dtype=np.float64)                            # [G]
    y = (y1[:, None, None]
         + ph[None, :, None] * bin_size[:, None, None]
         + (iy[None, None, :] + 0.5) * bin_size[:, None, None] / grid[:, None, None])

    sample_valid = iy[None, None, :] < grid[:, None, None]            # [M,1,G]
    in_range = (y >= -1.0) & (y <= H)
    w_valid = sample_valid & in_range                                 # [M,R,G]

    yc = np.maximum(y, 0.0)
    y_low = np.floor(yc).astype(np.int64)
    at_end = y_low >= H - 1
    y_low = np.where(at_end, H - 1, y_low)
    y_high = np.where(at_end, H - 1, np.minimum(y_low + 1, H - 1))
    yc = np.where(at_end, y_low.astype(np.float64), yc)
    ly = yc - y_low.astype(np.float64)

    w_low = np.where(w_valid, 1.0 - ly, 0.0)
    w_high = np.where(w_valid, ly, 0.0)

    W = np.zeros((M, pooled, H), dtype=np.float64)
    midx = np.broadcast_to(np.arange(M)[:, None, None], y_low.shape)
    pidx = np.broadcast_to(np.arange(pooled)[None, :, None], y_low.shape)
    np.add.at(W, (midx, pidx, y_low), w_low)
    np.add.at(W, (midx, pidx, y_high), w_high)
    W /= grid[:, None, None].astype(np.float64)

    return (W @ feat.astype(np.float64)).astype(np.float32)           # [M, R, D]


def pad_features_np(features):
    max_len = max(f.shape[0] for f in features)
    D = features[0].shape[1]
    padded, masks = [], []
    for f in features:
        T = f.shape[0]
        pf = np.zeros((max_len, D), dtype=np.float32)
        pf[:T] = f
        m = np.zeros((max_len,), dtype=np.float32)
        m[:T] = 1.0
        padded.append(pf)
        masks.append(m)
    return np.stack(padded, 0), np.stack(masks, 0)


def extract_roi_features_np(features_ori, proposals, is_training=True):
    """NumPy port of SEAL.extract_roi_features (deterministic, vectorized)."""
    B = len(proposals)
    num_prop = [p.shape[0] for p in proposals]
    max_num = max(num_prop)
    if is_training:
        max_num = min(max_num, MAX_PROPOSAL)
    D = features_ori.shape[-1]
    prop_features = np.zeros((B, max_num, ROI_SIZE, D), dtype=np.float32)
    prop_mask = np.zeros((B, max_num), dtype=np.float32)
    for i in range(B):
        feature = features_ori[i]
        proposal = np.asarray(proposals[i], dtype=np.float64)
        if proposal.shape[0] > max_num:
            # TODO(synk): torch uses randperm subsampling; deterministic truncation here.
            proposal = proposal[:max_num]
        start, end = proposal[:, 0], proposal[:, 1]
        len_prop = end - start
        start_ext = start - 0.25 * len_prop
        end_ext = end + 0.25 * len_prop
        fill_len = int(np.ceil(0.25 * len_prop.max())) + 1
        fill = np.zeros((fill_len, D), dtype=np.float32)
        feature_ext = np.concatenate([fill, feature, fill], axis=0)
        start_ext = start_ext + fill_len - 0.5
        end_ext = end_ext + fill_len - 0.5
        prop_features[i, :proposal.shape[0]] = _roi_align_1d_batch(
            feature_ext, start_ext, end_ext, ROI_SIZE)
        prop_mask[i, :proposal.shape[0]] = 1.0
    return prop_features, prop_mask


# ======================= host-side packing for the Pallas kernel ================
def prep_kernel_input(prop_features, max_tile=MAX_TILE_N):
    """[B, M, R, D] f32 -> ROI-slice max-pooled [3, Np, D] bf16 with
    Np = B*M padded up to a multiple of the row tile (tile multiple of 16)."""
    B, M, R, D = prop_features.shape
    r1 = ROI_SIZE // 6
    r5 = r1 * 5
    x = prop_features.reshape(B * M, R, D)
    pooled = np.stack([x[:, :r1].max(axis=1),
                       x[:, r1:r5].max(axis=1),
                       x[:, r5:].max(axis=1)], axis=0)                # [3, N, D]
    N = B * M
    tile = min(max_tile, ((N + 15) // 16) * 16)
    Np = ((N + tile - 1) // tile) * tile
    if Np != N:
        pooled = np.concatenate(
            [pooled, np.zeros((3, Np - N, D), dtype=np.float32)], axis=1)
    # bf16 on the host so only bf16 bytes cross PCIe / land in HBM.
    return pooled.astype(jnp.bfloat16), N, Np, tile


def pack_params(params):
    """Pack the 14 Linear/Conv1d weights into 4 lane-friendly arrays."""
    D = FEAT_DIM
    E = EMBED_DIM
    C1 = params['wc2'].shape[1]

    # fusion Linear(3D -> D): split along the input dim and distribute the
    # concatenate:  [f2-f1, f2, f2-f3] @ wf  ==  f2@(A+B+C) + f1@(-A) + f3@(-C)
    # (minus signs folded into the packed weights -> pure accumulating dots).
    wfA = params['wf'][:D]
    wfB = params['wf'][D:2 * D]
    wfC = params['wf'][2 * D:]
    w_fuse = jnp.stack([wfA + wfB + wfC, -wfA, -wfC], axis=0)          # (3, D, D)

    # first layers of the three heads -> one (D, 128) matmul (zero padded)
    w1 = jnp.concatenate([params['wc1'], params['wa1'], params['wi1']], axis=1)  # (D, 3E)
    w1 = jnp.pad(w1, ((0, 0), (0, HEAD_LANES - 3 * E)))                          # (D, 128)
    b1 = jnp.concatenate([params['bc1'], params['ba1'], params['bi1']], axis=1)  # (1, 3E)
    b1 = jnp.pad(b1, ((0, 0), (0, HEAD_LANES - 3 * E)))                          # (1, 128)

    # second layers -> block-diagonal (128, D) matmul; cols: [cas | attn | iou | 0...]
    w2 = jnp.zeros((HEAD_LANES, D), dtype=jnp.float32)
    w2 = w2.at[0:E, 0:C1].set(params['wc2'])
    w2 = w2.at[E:2 * E, C1:C1 + 1].set(params['wa2'])
    w2 = w2.at[2 * E:3 * E, C1 + 1:C1 + 2].set(params['wi2'])
    b2 = jnp.zeros((1, D), dtype=jnp.float32)
    b2 = b2.at[:, 0:C1].set(params['bc2'])
    b2 = b2.at[:, C1:C1 + 1].set(params['ba2'])
    b2 = b2.at[:, C1 + 1:C1 + 2].set(params['bi2'])

    biases = jnp.zeros((3, HEAD_LANES), dtype=jnp.float32)
    biases = biases.at[0, :D].set(params['bf'][0])
    biases = biases.at[1, :].set(b1[0])
    biases = biases.at[2, :D].set(b2[0])
    return w_fuse, w1, w2, biases


# ======================= Pallas kernel: Backbone_Proposal ======================
def _backbone_kernel(feat_ref, wfuse_ref, w1_ref, w2_ref, bias_ref, out_ref):
    # Pooled ROI features (one (TILE_N, D) bf16 slab per roi slice); read each
    # slab separately and upcast to f32 so the f32 MXU path / f32 accumulation
    # is preserved and no bf16 VPU arithmetic is needed (v5e-safe).
    f1 = feat_ref[0].astype(jnp.float32)                 # (TILE_N, D)
    f2 = feat_ref[1].astype(jnp.float32)
    f3 = feat_ref[2].astype(jnp.float32)

    b_all = bias_ref[...]                                # (3, 128)
    bf = b_all[0:1, :FEAT_DIM]                           # (1, D)
    b1 = b_all[1:2, :]                                   # (1, 128)
    b2 = b_all[2:3, :FEAT_DIM]                           # (1, D)

    # prop_fusion: Linear(3D -> D) + ReLU, lane-concat eliminated; the minus
    # signs are pre-folded into wfuse so this is 3 accumulating K=64 dots.
    # TODO(synk): nn.Dropout(train) randomness not reproduced; identity used.
    pre = (jnp.dot(f2, wfuse_ref[0], preferred_element_type=jnp.float32)
           + jnp.dot(f1, wfuse_ref[1], preferred_element_type=jnp.float32)
           + jnp.dot(f3, wfuse_ref[2], preferred_element_type=jnp.float32)
           + bf)
    fuse = jnp.maximum(pre, 0.0)                         # (TILE_N, D)

    # three heads fused: one (D,128) matmul + ReLU, one block-diagonal (128,D)
    h = jnp.maximum(
        jnp.dot(fuse, w1_ref[...], preferred_element_type=jnp.float32) + b1, 0.0)  # (TILE_N, 128)
    heads = jnp.dot(h, w2_ref[...], preferred_element_type=jnp.float32) + b2       # (TILE_N, D)

    # single lane-dense 128-wide store: [fuse(64) | cas | attn | iou | 0 pad]
    out_ref[...] = jnp.concatenate([fuse, heads], axis=-1).astype(out_ref.dtype)


def seal_backbone(pooled_feat, packed, tile_n):
    """pooled_feat: [3, Np, D] bf16 (Np = B*M padded to a multiple of tile_n)
       -> [Np, 128] f32 slab = [fuse(64) | cas(C+1) | attn(1) | iou(1) | zeros]."""
    w_fuse, w1, w2, biases = packed
    _, Np, D = pooled_feat.shape
    grid = (pl.cdiv(Np, tile_n),)

    # VMEM budget per step at tile_n=512 (D=64 lane-padded to 128 in VMEM):
    #   input  3*512*128*2B ~= 384 KiB, output 512*128*4B ~= 256 KiB,
    #   x2 double buffering + ~100 KiB weights  -> ~1.4 MiB, far below the
    #   v5e 16 MiB scoped default and v7x 64 MiB physical VMEM.
    return pl.pallas_call(
        _backbone_kernel,
        out_shape=jax.ShapeDtypeStruct((Np, HEAD_LANES), jnp.float32),
        grid=grid,
        in_specs=[
            pl.BlockSpec((3, tile_n, D), lambda i: (0, i, 0)),
            # constant index_maps -> weights/biases DMA'd once, VMEM-resident
            pl.BlockSpec(w_fuse.shape, lambda i: (0, 0, 0)),
            pl.BlockSpec(w1.shape, lambda i: (0, 0)),
            pl.BlockSpec(w2.shape, lambda i: (0, 0)),
            pl.BlockSpec(biases.shape, lambda i: (0, 0)),
        ],
        out_specs=pl.BlockSpec((tile_n, HEAD_LANES), lambda i: (i, 0)),
        compiler_params=pltpu.CompilerParams(
            dimension_semantics=("parallel",)),          # v7x dual-TC sharding
    )(pooled_feat, w_fuse, w1, w2, biases)


def seal_forward(features_list, proposals_list, params, is_training=True):
    """Mirrors SEAL.forward output dictionary (tensors already re-transposed,
    exactly like the PyTorch code does before returning)."""
    features_ori, mask = pad_features_np(features_list)
    prop_features, prop_mask = extract_roi_features_np(
        features_ori, proposals_list, is_training)
    B, M, R, D = prop_features.shape
    C1 = params['wc2'].shape[1]

    pooled, N, Np, tile = prep_kernel_input(prop_features)
    packed = pack_params(params)
    slab = seal_backbone(jnp.asarray(pooled), packed, tile)    # [Np, 128]

    slab = slab[:N].reshape(B, M, HEAD_LANES)
    fuse = slab[..., :D]                                       # [B, M, D]
    cas = slab[..., D:D + C1]                                  # [B, M, C+1]
    attn = slab[..., D + C1:D + C1 + 1]                        # [B, M, 1]
    iou = slab[..., D + C1 + 1:D + C1 + 2]                     # [B, M, 1]

    return {
        'prop_fused_cas': cas,                       # [B, M, C+1]
        'prop_fused_attn': attn,                     # [B, M, 1]
        'prop_fused_iou': iou,                       # [B, M, 1]
        'prop_mask': jnp.asarray(prop_mask),         # [B, M]
        'features': jnp.asarray(features_ori),       # [B, T, D]
        'prop_fused_feat_fuse': fuse,                # [B, M, D]
        'mask': jnp.asarray(mask),                   # [B, T]
    }


# ======================= reference (plain JAX) for verification ================
def pooled_heads_ref(f1, f2, f3, params):
    x = jnp.concatenate([f2 - f1, f2, f2 - f3], axis=-1)
    fuse = jax.nn.relu(x @ params['wf'] + params['bf'])

    def head(w1, b1, w2, b2):
        return jax.nn.relu(fuse @ w1 + b1) @ w2 + b2

    cas = head(params['wc1'], params['bc1'], params['wc2'], params['bc2'])
    attn = head(params['wa1'], params['ba1'], params['wa2'], params['ba2'])
    iou = head(params['wi1'], params['bi1'], params['wi2'], params['bi2'])
    return cas, attn, iou, fuse


def backbone_ref(prop_features, params):
    r1 = ROI_SIZE // 6
    r5 = r1 * 5
    f1 = prop_features[:, :, :r1, :].max(2)
    f2 = prop_features[:, :, r1:r5, :].max(2)
    f3 = prop_features[:, :, r5:, :].max(2)
    return pooled_heads_ref(f1, f2, f3, params)


# ======================= deterministic parameter init ==========================
def init_params(key):
    ks = jax.random.split(key, 14)
    s = 0.05

    def w(k, shape):
        return jax.random.normal(k, shape, dtype=jnp.float32) * s

    C1 = N_CLASS + 1
    return {
        # note: stored as [in, out] (transposed vs torch Linear/Conv1d weights)
        'wf':  w(ks[0],  (FEAT_DIM * 3, FEAT_DIM)), 'bf':  w(ks[1],  (1, FEAT_DIM)),
        'wc1': w(ks[2],  (FEAT_DIM, EMBED_DIM)),    'bc1': w(ks[3],  (1, EMBED_DIM)),
        'wc2': w(ks[4],  (EMBED_DIM, C1)),          'bc2': w(ks[5],  (1, C1)),
        'wa1': w(ks[6],  (FEAT_DIM, EMBED_DIM)),    'ba1': w(ks[7],  (1, EMBED_DIM)),
        'wa2': w(ks[8],  (EMBED_DIM, 1)),           'ba2': w(ks[9],  (1, 1)),
        'wi1': w(ks[10], (FEAT_DIM, EMBED_DIM)),    'bi1': w(ks[11], (1, EMBED_DIM)),
        'wi2': w(ks[12], (EMBED_DIM, 1)),           'bi2': w(ks[13], (1, 1)),
    }


if __name__ == "__main__":
    root = jax.random.PRNGKey(0)
    k_param, k_f0, k_f1 = jax.random.split(root, 3)
    params = init_params(k_param)

    # two "videos" of different lengths (list of [T, D] features)
    f0 = np.asarray(jax.random.normal(k_f0, (20, FEAT_DIM), dtype=jnp.float32))
    f1 = np.asarray(jax.random.normal(k_f1, (16, FEAT_DIM), dtype=jnp.float32))
    features_list = [f0, f1]

    # deterministic proposals [M_i, 2] (start, end) in frame coordinates
    prop0 = np.array([[1.0, 5.0], [3.0, 8.0], [5.0, 9.0], [8.0, 14.0], [12.0, 18.0]],
                     dtype=np.float32)
    prop1 = np.array([[0.0, 4.0], [2.0, 7.0], [4.0, 10.0], [6.0, 12.0],
                      [8.0, 13.0], [10.0, 15.0], [1.0, 14.0]], dtype=np.float32)
    proposals_list = [prop0, prop1]

    outputs = seal_forward(features_list, proposals_list, params, is_training=True)
    outputs = jax.block_until_ready(outputs)

    # --- verify the Pallas kernel against plain-JAX references of Backbone_Proposal
    features_ori, _ = pad_features_np(features_list)
    prop_features, _ = extract_roi_features_np(features_ori, proposals_list, True)
    pf = jnp.asarray(prop_features)

    # exact f32 reference (loose tolerance: kernel input is bf16-rounded)
    ref_cas, ref_attn, ref_iou, ref_fuse = backbone_ref(pf, params)

    # matched-precision reference (same bf16-rounded pooled inputs as the kernel)
    r1, r5 = ROI_SIZE // 6, ROI_SIZE // 6 * 5

    def _bf(x):
        return x.astype(jnp.bfloat16).astype(jnp.float32)

    m_cas, m_attn, m_iou, m_fuse = pooled_heads_ref(
        _bf(pf[:, :, :r1, :].max(2)), _bf(pf[:, :, r1:r5, :].max(2)),
        _bf(pf[:, :, r5:, :].max(2)), params)

    checks = [
        (outputs['prop_fused_cas'], ref_cas, m_cas),
        (outputs['prop_fused_attn'], ref_attn, m_attn),
        (outputs['prop_fused_iou'], ref_iou, m_iou),
        (outputs['prop_fused_feat_fuse'], ref_fuse, m_fuse),
    ]
    for got, ref, matched in checks:
        np.testing.assert_allclose(np.asarray(got), np.asarray(matched),
                                   rtol=2e-3, atol=2e-3)
        np.testing.assert_allclose(np.asarray(got), np.asarray(ref),
                                   rtol=2e-2, atol=2e-2)

    print("KERNEL_OK")
</pallas_src>

<mosaic_0001>
module attributes {stable_mosaic.version = 11 : i64} {
  func.func @_backbone_kernel(%arg0: i32, %arg1: memref<3x16x64xbf16, #tpu.memory_space<vmem>>, %arg2: memref<3x64x64xf32, #tpu.memory_space<vmem>>, %arg3: memref<64x128xf32, #tpu.memory_space<vmem>>, %arg4: memref<128x64xf32, #tpu.memory_space<vmem>>, %arg5: memref<3x128xf32, #tpu.memory_space<vmem>>, %arg6: memref<16x128xf32, #tpu.memory_space<vmem>>) attributes {dimension_semantics = [#tpu.dimension_semantics<parallel>], iteration_bounds = array<i64: 1>, scalar_prefetch = 0 : i64, scratch_operands = 0 : i64, tpu.core_type = #tpu.core_type<tc>, window_params = [{transform_indices = @transform_0, window_bounds = array<i64: 3, 16, 64>}, {pipeline_mode = #tpu.pipeline_mode<synchronous>, transform_indices = @transform_1, window_bounds = array<i64: 3, 64, 64>}, {pipeline_mode = #tpu.pipeline_mode<synchronous>, transform_indices = @transform_2, window_bounds = array<i64: 64, 128>}, {pipeline_mode = #tpu.pipeline_mode<synchronous>, transform_indices = @transform_3, window_bounds = array<i64: 128, 64>}, {pipeline_mode = #tpu.pipeline_mode<synchronous>, transform_indices = @transform_4, window_bounds = array<i64: 3, 128>}, {transform_indices = @transform_5, window_bounds = array<i64: 16, 128>}]} {
    %c0 = arith.constant 0 : index
    %c0_0 = arith.constant 0 : index
    %c0_1 = arith.constant 0 : index
    %0 = vector.load %arg1[%c0, %c0_0, %c0_1] : memref<3x16x64xbf16, #tpu.memory_space<vmem>>, vector<1x16x64xbf16>
    %1 = vector.shape_cast %0 : vector<1x16x64xbf16> to vector<16x64xbf16>
    %2 = arith.extf %1 : vector<16x64xbf16> to vector<16x64xf32>
    %c1 = arith.constant 1 : index
    %c0_2 = arith.constant 0 : index
    %c0_3 = arith.constant 0 : index
    %3 = vector.load %arg1[%c1, %c0_2, %c0_3] : memref<3x16x64xbf16, #tpu.memory_space<vmem>>, vector<1x16x64xbf16>
    %4 = vector.shape_cast %3 : vector<1x16x64xbf16> to vector<16x64xbf16>
    %5 = arith.extf %4 : vector<16x64xbf16> to vector<16x64xf32>
    %c2 = arith.constant 2 : index
    %c0_4 = arith.constant 0 : index
    %c0_5 = arith.constant 0 : index
    %6 = vector.load %arg1[%c2, %c0_4, %c0_5] : memref<3x16x64xbf16, #tpu.memory_space<vmem>>, vector<1x16x64xbf16>
    %7 = vector.shape_cast %6 : vector<1x16x64xbf16> to vector<16x64xbf16>
    %8 = arith.extf %7 : vector<16x64xbf16> to vector<16x64xf32>
    %c0_6 = arith.constant 0 : index
    %c0_7 = arith.constant 0 : index
    %9 = vector.load %arg5[%c0_6, %c0_7] : memref<3x128xf32, #tpu.memory_space<vmem>>, vector<3x128xf32>
    %10 = vector.extract_strided_slice %9 {offsets = [0, 0], sizes = [1, 64], strides = [1, 1]} : vector<3x128xf32> to vector<1x64xf32>
    %11 = vector.extract_strided_slice %9 {offsets = [1, 0], sizes = [1, 128], strides = [1, 1]} : vector<3x128xf32> to vector<1x128xf32>
    %12 = vector.extract_strided_slice %9 {offsets = [2, 0], sizes = [1, 64], strides = [1, 1]} : vector<3x128xf32> to vector<1x64xf32>
    %c0_8 = arith.constant 0 : index
    %c0_9 = arith.constant 0 : index
    %c0_10 = arith.constant 0 : index
    %13 = vector.load %arg2[%c0_8, %c0_9, %c0_10] : memref<3x64x64xf32, #tpu.memory_space<vmem>>, vector<1x64x64xf32>
    %14 = vector.shape_cast %13 : vector<1x64x64xf32> to vector<64x64xf32>
    %cst = arith.constant dense<0.000000e+00> : vector<16x64xf32>
    %15 = tpu.matmul %5, %14, %cst {dimension_numbers = #tpu.dot_dimension_numbers<[1], [0], [0], [1], [0, 0, 1, 1], [], []>} : vector<16x64xf32>, vector<64x64xf32>, vector<16x64xf32> -> vector<16x64xf32>
    %c1_11 = arith.constant 1 : index
    %c0_12 = arith.constant 0 : index
    %c0_13 = arith.constant 0 : index
    %16 = vector.load %arg2[%c1_11, %c0_12, %c0_13] : memref<3x64x64xf32, #tpu.memory_space<vmem>>, vector<1x64x64xf32>
    %17 = vector.shape_cast %16 : vector<1x64x64xf32> to vector<64x64xf32>
    %cst_14 = arith.constant dense<0.000000e+00> : vector<16x64xf32>
    %18 = tpu.matmul %2, %17, %cst_14 {dimension_numbers = #tpu.dot_dimension_numbers<[1], [0], [0], [1], [0, 0, 1, 1], [], []>} : vector<16x64xf32>, vector<64x64xf32>, vector<16x64xf32> -> vector<16x64xf32>
    %19 = arith.addf %15, %18 : vector<16x64xf32>
    %c2_15 = arith.constant 2 : index
    %c0_16 = arith.constant 0 : index
    %c0_17 = arith.constant 0 : index
    %20 = vector.load %arg2[%c2_15, %c0_16, %c0_17] : memref<3x64x64xf32, #tpu.memory_space<vmem>>, vector<1x64x64xf32>
    %21 = vector.shape_cast %20 : vector<1x64x64xf32> to vector<64x64xf32>
    %cst_18 = arith.constant dense<0.000000e+00> : vector<16x64xf32>
    %22 = tpu.matmul %8, %21, %cst_18 {dimension_numbers = #tpu.dot_dimension_numbers<[1], [0], [0], [1], [0, 0, 1, 1], [], []>} : vector<16x64xf32>, vector<64x64xf32>, vector<16x64xf32> -> vector<16x64xf32>
    %23 = arith.addf %19, %22 : vector<16x64xf32>
    %24 = vector.broadcast %10 : vector<1x64xf32> to vector<16x64xf32>
    %25 = arith.addf %23, %24 : vector<16x64xf32>
    %cst_19 = arith.constant 0.000000e+00 : f32
    %26 = vector.broadcast %cst_19 : f32 to vector<16x64xf32>
    %27 = arith.maximumf %25, %26 : vector<16x64xf32>
    %c0_20 = arith.constant 0 : index
    %c0_21 = arith.constant 0 : index
    %28 = vector.load %arg3[%c0_20, %c0_21] : memref<64x128xf32, #tpu.memory_space<vmem>>, vector<64x128xf32>
    %cst_22 = arith.constant dense<0.000000e+00> : vector<16x128xf32>
    %29 = tpu.matmul %27, %28, %cst_22 {dimension_numbers = #tpu.dot_dimension_numbers<[1], [0], [0], [1], [0, 0, 1, 1], [], []>} : vector<16x64xf32>, vector<64x128xf32>, vector<16x128xf32> -> vector<16x128xf32>
    %30 = vector.broadcast %11 : vector<1x128xf32> to vector<16x128xf32>
    %31 = arith.addf %29, %30 : vector<16x128xf32>
    %cst_23 = arith.constant 0.000000e+00 : f32
    %32 = vector.broadcast %cst_23 : f32 to vector<16x128xf32>
    %33 = arith.maximumf %31, %32 : vector<16x128xf32>
    %c0_24 = arith.constant 0 : index
    %c0_25 = arith.constant 0 : index
    %34 = vector.load %arg4[%c0_24, %c0_25] : memref<128x64xf32, #tpu.memory_space<vmem>>, vector<128x64xf32>
    %cst_26 = arith.constant dense<0.000000e+00> : vector<16x64xf32>
    %35 = tpu.matmul %33, %34, %cst_26 {dimension_numbers = #tpu.dot_dimension_numbers<[1], [0], [0], [1], [0, 0, 1, 1], [], []>} : vector<16x128xf32>, vector<128x64xf32>, vector<16x64xf32> -> vector<16x64xf32>
    %36 = vector.broadcast %12 : vector<1x64xf32> to vector<16x64xf32>
    %37 = arith.addf %35, %36 : vector<16x64xf32>
    %38 = tpu.concatenate %27, %37 in 1 : vector<16x64xf32>, vector<16x64xf32> -> vector<16x128xf32>
    %c0_27 = arith.constant 0 : index
    %c0_28 = arith.constant 0 : index
    %39 = vector.load %arg6[%c0_27, %c0_28] : memref<16x128xf32, #tpu.memory_space<vmem>>, vector<16x128xf32>
    tpu.vector_store %arg6[%c0_27, %c0_28], %38 {strides = array<i32>} : memref<16x128xf32, #tpu.memory_space<vmem>>, vector<16x128xf32>,
    return
  }
  func.func @transform_0(%arg0: i32) -> (i32, i32, i32) {
    %c0_i32 = arith.constant 0 : i32
    %c0_i32_0 = arith.constant 0 : i32
    %c0_i32_1 = arith.constant 0 : i32
    return %c0_i32, %arg0, %c0_i32_0 : i32, i32, i32
  }
  func.func @transform_1(%arg0: i32) -> (i32, i32, i32) {
    %c0_i32 = arith.constant 0 : i32
    %c0_i32_0 = arith.constant 0 : i32
    %c0_i32_1 = arith.constant 0 : i32
    %c0_i32_2 = arith.constant 0 : i32
    return %c0_i32, %c0_i32_0, %c0_i32_1 : i32, i32, i32
  }
  func.func @transform_2(%arg0: i32) -> (i32, i32) {
    %c0_i32 = arith.constant 0 : i32
    %c0_i32_0 = arith.constant 0 : i32
    %c0_i32_1 = arith.constant 0 : i32
    return %c0_i32, %c0_i32_0 : i32, i32
  }
  func.func @transform_3(%arg0: i32) -> (i32, i32) {
    %c0_i32 = arith.constant 0 : i32
    %c0_i32_0 = arith.constant 0 : i32
    %c0_i32_1 = arith.constant 0 : i32
    return %c0_i32, %c0_i32_0 : i32, i32
  }
  func.func @transform_4(%arg0: i32) -> (i32, i32) {
    %c0_i32 = arith.constant 0 : i32
    %c0_i32_0 = arith.constant 0 : i32
    %c0_i32_1 = arith.constant 0 : i32
    return %c0_i32, %c0_i32_0 : i32, i32
  }
  func.func @transform_5(%arg0: i32) -> (i32, i32) {
    %c0_i32 = arith.constant 0 : i32
    %c0_i32_0 = arith.constant 0 : i32
    return %arg0, %c0_i32 : i32, i32
  }
}

</mosaic_0001>

<bundles_post_ra>
// kernel: tpu_custom_call.1
= control target key start
LH: loop header
LB: loop body
LE: loop exit
PB: predicated region body
PF: predicated region fallthrough
CT: control target
= control target key end

     0   :  { %10 = vsyncpa [#allocation3], 0  ;;  %s1171_s0 = inlined_call_operand.hbm [shape: bf16[3,16,64], index: 0, kind: input, shape index: {}]   ;;  %s1172_s1 = inlined_call_operand.vmem [shape: f32[3,64,64], index: 1, kind: input, shape index: {}]   ;;  %s1173_s2 = inlined_call_operand.hbm [shape: f32[64,128], index: 2, kind: input, shape index: {}]   ;;  %s1174_s3 = inlined_call_operand.vmem [shape: f32[128,64], index: 3, kind: input, shape index: {}]   ;;  %s1175_s4 = inlined_call_operand.vmem [shape: f32[3,128], index: 4, kind: input, shape index: {}]   ;;  %s1176_s5 = inlined_call_operand.hbm [shape: f32[16,128], index: 5, kind: output, shape index: {}]  }
   0x1   :  { %11 = vsyncpa [#allocation6], 0 }
   0x2   :  { %12 = vsyncpa [#allocation4], 0  ;;  %s948_s18 = smov [#allocation2]   ;;  %s876_s22 = scalar_lea.hbm %s1171_s0, 384 }
   0x3   :  { %s18_s19 = sshll.u32 %s948_s18, 4  ;;  %p877_p0 = scmp.ne.s32.totalorder %s1171_s0, %s876_s22  ;;  %s19_s19 = int_to_ptr.vmem [resolvable:$true] %s18_s19 }
   0x4   :  { %p880_p1 = scmp.lt.u32.totalorder %s876_s22, %s1171_s0 }
   0x6   :  { %p882_p2 = pnand %p880_p1, %p877_p0 }
   0x8   :  { %885 = shalt.err (!%p882_p2)
}
   0x9   :  { %s886_s27 = scalar_lea.vmem %s19_s19, 384  ;;  %p891_p4 = scmp.lt.s32.totalorder %s19_s19, %s19_s19 }
   0xa   :  { %p887_p3 = scmp.ne.s32.totalorder %s19_s19, %s886_s27  ;;  %p892_p5 = scmp.lt.s32.totalorder %s886_s27, %s886_s27 }
   0xc   :  { %p893_p6 = por %p892_p5, %p891_p4 }
   0xe   :  { %p894_p7 = pnand %p893_p6, %p887_p3 }
  0x10   :  { %897 = shalt.err (!%p894_p7)
}
  0x11   :  { %s949_s28 = smov 64   ;;  %s950_s29 = smov 4  }
  0x12   :  { %24 = dma.hbm_to_vmem [thread:$0]  %s1171_s0, 384, %s19_s19, [#allocation3], %s949_s28, %s949_s28, %s950_s29  }
  0x13   :  { %s951_s7 = smov [#allocation5]   ;;  %s898_s11 = scalar_lea.hbm %s1173_s2, 1024 }
  0x14   :  { %s32_s8 = sshll.u32 %s951_s7, 4  ;;  %p899_p8 = scmp.ne.s32.totalorder %s1173_s2, %s898_s11  ;;  %s33_s8 = int_to_ptr.vmem [resolvable:$true] %s32_s8 }
  0x15   :  { %p902_p9 = scmp.lt.u32.totalorder %s898_s11, %s1173_s2 }
  0x17   :  { %p904_p10 = pnand %p902_p9, %p899_p8 }
  0x19   :  { %907 = shalt.err (!%p904_p10)
}
  0x1a   :  { %s908_s16 = scalar_lea.vmem %s33_s8, 1024  ;;  %p913_p12 = scmp.lt.s32.totalorder %s33_s8, %s33_s8 }
  0x1b   :  { %p909_p11 = scmp.ne.s32.totalorder %s33_s8, %s908_s16  ;;  %p914_p13 = scmp.lt.s32.totalorder %s908_s16, %s908_s16 }
  0x1d   :  { %p915_p0 = por %p914_p13, %p913_p12 }
  0x1f   :  { %p916_p1 = pnand %p915_p0, %p909_p11 }
  0x21   :  { %919 = shalt.err (!%p916_p1)
}
  0x22   :  { %s952_s0 = smov 128   ;;  %s953_s17 = smov 8  }
  0x23   :  { %38 = dma.hbm_to_vmem [thread:$0]  %s1173_s2, 1024, %s33_s8, [#allocation6], %s952_s0, %s952_s0, %s953_s17  }
  0x24   :  { %942 = dma.done.wait [#allocation3], 384  }
  0x25   :  { %943 = vsyncadd [#allocation3], 4294966912 }
  0x26   :  { %944 = dma.done.wait [#allocation6], 1024  }
  0x27   :  { %945 = vsyncadd [#allocation6], 4294966272  ;;  %v564_v0 = vld [vmem:[%s1172_s1 + $0x40] sm:$0xff]  ;;  %v565_v1 = vld [vmem:[%s1172_s1 + $0x48] sm:$0xff]  ;;  %vm81_vm0 = vcmask 523264   ;;  %v336_v60 = vlaneseq }
  0x28   :  { %v566_v2 = vld [vmem:[%s1172_s1 + $0x50] sm:$0xff]  ;;  %v769_v3 = vpack.c.bf16 %v565_v1, %v564_v0  ;;  %v567_v4 = vld [vmem:[%s1172_s1 + $0x58] sm:$0xff]  ;;  %v568_v6 = vld [vmem:[%s1172_s1 + $0x60] sm:$0xff] }
  0x29   :  { %v773_v5 = vpack.c.bf16 %v567_v4, %v566_v2  ;;  %v569_v7 = vld [vmem:[%s1172_s1 + $0x68] sm:$0xff]  ;;  %v589_v8 = vld [vmem:[#allocation2] sm:$0xff]   ;;  %v570_v11 = vld [vmem:[%s1172_s1 + $0x70] sm:$0xff]  ;;  %v337_v61 = vshrl.u32 %v336_v60, 7 }
  0x2a   :  { %770 = vmatprep.subr.bf16.mxu0 %v769_v3  ;;  %v590_v9 = vunpack.c.l.bf16 %v589_v8  ;;  %v777_v10 = vpack.c.bf16 %v569_v7, %v568_v6  ;;  %v571_v12 = vld [vmem:[%s1172_s1 + $0x78] sm:$0xff]  ;;  %v345_v15 = vld [vmem:[#allocation5 + $0x8] sm:$0xff]  ;;  %v346_v16 = vld [vmem:[#allocation5 + $0x10] sm:$0xff]  ;;  %v591_v29 = vunpack.c.h.bf16 %v589_v8 }
  0x2b   :  { %772 = vmatpush3.bf16.msra.mxu0 %v769_v3  ;;  %v781_v13 = vpack.c.bf16 %v571_v12, %v570_v11  ;;  %v344_v14 = vld [vmem:[#allocation5] sm:$0xff]  ;;  %v64_v17 = vld [vmem:[%s1172_s1] sm:$0xff]  ;;  %v65_v18 = vld [vmem:[%s1172_s1 + $0x8] sm:$0xff]  ;;  %v338_v62 = vsub.s32 0, %v337_v61 }
  0x2c   :  { %774 = vmatprep.subr.bf16.mxu0 %v773_v5  ;;  %674 = vmatprep.mubr.msk.f32.mxu0 %vm81_vm0, %v590_v9  ;;  %v817_v19 = vpack.c.bf16 %v345_v15, %v344_v14  ;;  %v347_v20 = vld [vmem:[#allocation5 + $0x18] sm:$0xff]  ;;  %v348_v22 = vld [vmem:[#allocation5 + $0x20] sm:$0xff]  ;;  %v349_v23 = vld [vmem:[#allocation5 + $0x28] sm:$0xff]  ;;  %v785_v24 = vpack.c.bf16 %v65_v18, %v64_v17 }
  0x2d   :  { %v821_v21 = vpack.c.bf16 %v347_v20, %v346_v16  ;;  %v593_v25 = vld [vmem:[#allocation2 + $0x8] sm:$0xff]   ;;  %v66_v26 = vld [vmem:[%s1172_s1 + $0x10] sm:$0xff]  ;;  %v67_v27 = vld [vmem:[%s1172_s1 + $0x18] sm:$0xff]  ;;  %v825_v28 = vpack.c.bf16 %v349_v23, %v348_v22 }
  0x2e   :  { %818 = vmatprep.subr.bf16.mxu1 %v817_v19  ;;  %v594_v30 = vunpack.c.l.bf16 %v593_v25  ;;  %v789_v31 = vpack.c.bf16 %v67_v27, %v66_v26  ;;  %v68_v32 = vld [vmem:[%s1172_s1 + $0x20] sm:$0xff]  ;;  %v69_v33 = vld [vmem:[%s1172_s1 + $0x28] sm:$0xff]  ;;  %v70_v35 = vld [vmem:[%s1172_s1 + $0x30] sm:$0xff]  ;;  %v595_v44 = vunpack.c.h.bf16 %v593_v25 }
  0x2f   :  { %776 = vmatpush3.bf16.msra.mxu0 %v773_v5  ;;  %820 = vmatpush3.bf16.msra.mxu1 %v817_v19  ;;  %v793_v34 = vpack.c.bf16 %v69_v33, %v68_v32  ;;  %v71_v36 = vld [vmem:[%s1172_s1 + $0x38] sm:$0xff]  ;;  %v576_v38 = vld [vmem:[%s1172_s1 + $0x80] sm:$0xff]  ;;  %v577_v39 = vld [vmem:[%s1172_s1 + $0x88] sm:$0xff] }
  0x30   :  { %778 = vmatprep.subr.bf16.mxu0 %v777_v10  ;;  %822 = vmatprep.subr.bf16.mxu1 %v821_v21  ;;  %v797_v37 = vpack.c.bf16 %v71_v36, %v70_v35  ;;  %v801_v40 = vpack.c.bf16 %v577_v39, %v576_v38  ;;  %v597_v41 = vld [vmem:[#allocation2 + $0x10] sm:$0xff]   ;;  %v579_v43 = vld [vmem:[%s1172_s1 + $0x98] sm:$0xff]  ;;  %v580_v47 = vld [vmem:[%s1172_s1 + $0xa0] sm:$0xff]  ;;  %v457_v36 = vsub.s32 2, %v337_v61 }
  0x31   :  { %v578_v42 = vld [vmem:[%s1172_s1 + $0x90] sm:$0xff]  ;;  %v598_v45 = vunpack.c.l.bf16 %v597_v41  ;;  %v581_v48 = vld [vmem:[%s1172_s1 + $0xa8] sm:$0xff]  ;;  %v583_v51 = vld [vmem:[%s1172_s1 + $0xb8] sm:$0xff]  ;;  %v599_v53 = vunpack.c.h.bf16 %v597_v41 }
  0x32   :  { %v805_v46 = vpack.c.bf16 %v579_v43, %v578_v42  ;;  %v809_v49 = vpack.c.bf16 %v581_v48, %v580_v47  ;;  %v582_v50 = vld [vmem:[%s1172_s1 + $0xb0] sm:$0xff]  ;;  %v350_v54 = vld [vmem:[#allocation5 + $0x30] sm:$0xff]  ;;  %v439_v57 = vld [vmem:[%s1174_s3] sm:$0xff] }
  0x33   :  { %780 = vmatpush3.bf16.msra.mxu0 %v777_v10  ;;  %824 = vmatpush3.bf16.msra.mxu1 %v821_v21  ;;  %v813_v52 = vpack.c.bf16 %v583_v51, %v582_v50  ;;  %v351_v55 = vld [vmem:[#allocation5 + $0x38] sm:$0xff]  ;;  %v440_v58 = vld [vmem:[%s1174_s3 + $0x8] sm:$0xff]  ;;  %v63_v63 = vld [vmem:[%s1175_s4] sm:$0x7] }
  0x34   :  { %782 = vmatprep.subr.bf16.mxu0 %v781_v13  ;;  %826 = vmatprep.subr.bf16.mxu1 %v825_v28  ;;  %v829_v56 = vpack.c.bf16 %v351_v55, %v350_v54  ;;  %v833_v59 = vpack.c.bf16 %v440_v58, %v439_v57  ;;  %v339_v0 = vrot.slane %v63_v63, %v338_v62  ;;  %v441_v5 = vld [vmem:[%s1174_s3 + $0x10] sm:$0xff]  ;;  %v442_v6 = vld [vmem:[%s1174_s3 + $0x18] sm:$0xff]  ;;  %v443_v10 = vld [vmem:[%s1174_s3 + $0x20] sm:$0xff] }
  0x35   :  { %v837_v9 = vpack.c.bf16 %v442_v6, %v441_v5  ;;  %v444_v11 = vld [vmem:[%s1174_s3 + $0x28] sm:$0xff]  ;;  %v446_v14 = vld [vmem:[%s1174_s3 + $0x38] sm:$0xff]  ;;  %v447_v16 = vld [vmem:[%s1174_s3 + $0x40] sm:$0xff] }
  0x36   :  { %v841_v12 = vpack.c.bf16 %v444_v11, %v443_v10  ;;  %v448_v17 = vld [vmem:[%s1174_s3 + $0x48] sm:$0xff]  ;;  %v449_v19 = vld [vmem:[%s1174_s3 + $0x50] sm:$0xff]  ;;  %v450_v20 = vld [vmem:[%s1174_s3 + $0x58] sm:$0xff] }
  0x37   :  { %784 = vmatpush3.bf16.msra.mxu0 %v781_v13  ;;  %828 = vmatpush3.bf16.msra.mxu1 %v825_v28  ;;  %v445_v13 = vld [vmem:[%s1174_s3 + $0x30] sm:$0xff]  ;;  %v849_v18 = vpack.c.bf16 %v448_v17, %v447_v16  ;;  %v853_v21 = vpack.c.bf16 %v450_v20, %v449_v19  ;;  %v451_v22 = vld [vmem:[%s1174_s3 + $0x60] sm:$0xff]  ;;  %v452_v23 = vld [vmem:[%s1174_s3 + $0x68] sm:$0xff]  ;;  %v354_v28 = vsub.s32 1, %v337_v61 }
  0x38   :  { %786 = vmatprep.subr.bf16.mxu0 %v785_v24  ;;  %830 = vmatprep.subr.bf16.mxu1 %v829_v56  ;;  %v845_v15 = vpack.c.bf16 %v446_v14, %v445_v13  ;;  %v453_v25 = vld [vmem:[%s1174_s3 + $0x70] sm:$0xff]  ;;  %v454_v26 = vld [vmem:[%s1174_s3 + $0x78] sm:$0xff]  ;;  %s954_s3 = smov [#allocation7]  }
  0x39   :  { %v861_v27 = vpack.c.bf16 %v454_v26, %v453_v25  ;;  %s551_s27 = sshll.u32 %s954_s3, 4  ;;  %s552_s27 = int_to_ptr.vmem [resolvable:$true] %s551_s27 }
  0x3a   :  { %675 = vmatmul.mubr.msk.f32.vlgmr.msra.gmra.mrb[0].mxu0 %vm81_vm0, %v591_v29  ;;  %v355_v29 = vrot.slane %v63_v63, %v354_v28  ;;  %s920_s2 = scalar_lea.vmem %s552_s27, 256  ;;  %p925_p3 = scmp.lt.s32.totalorder %s552_s27, %s552_s27 }
  0x3b   :  { %788 = vmatpush3.bf16.msra.mxu0 %v785_v24  ;;  %693 = vmatprep.mubr.msk.f32.mxu0 %vm81_vm0, %v594_v30  ;;  %v857_v24 = vpack.c.bf16 %v452_v23, %v451_v22  ;;  %p921_p2 = scmp.ne.s32.totalorder %s552_s27, %s920_s2  ;;  %p926_p4 = scmp.lt.s32.totalorder %s920_s2, %s920_s2 }
  0x3c   :  { %790 = vmatprep.subr.bf16.mxu0 %v789_v31  ;;  %832 = vmatpush3.bf16.msra.mxu1 %v829_v56 }
  0x3d   :  { %834 = vmatprep.subr.bf16.mxu1 %v833_v59  ;;  %p927_p5 = por %p926_p4, %p925_p3 }
  0x3f   :  { %792 = vmatpush3.bf16.msra.mxu0 %v789_v31  ;;  %p928_p6 = pnand %p927_p5, %p921_p2 }
  0x40   :  { %794 = vmatprep.subr.bf16.mxu0 %v793_v34 }
  0x43   :  { %796 = vmatpush3.bf16.msra.mxu0 %v793_v34 }
  0x44   :  { %798 = vmatprep.subr.bf16.mxu0 %v797_v37 }
  0x47   :  { %800 = vmatpush3.bf16.msra.mxu0 %v797_v37  ;;  %v458_v37 = vrot.slane %v63_v63, %v457_v36 }
  0x48   :  { %802 = vmatprep.subr.bf16.mxu0 %v801_v40 }
  0x4a   :  { %694 = vmatmul.mubr.msk.f32.vlgmr.msra.gmra.mrb[0].mxu0 %vm81_vm0, %v595_v44 }
  0x4b   :  { %804 = vmatpush3.bf16.msra.mxu0 %v801_v40  ;;  %712 = vmatprep.mubr.msk.f32.mxu0 %vm81_vm0, %v598_v45 }
  0x4c   :  { %806 = vmatprep.subr.bf16.mxu0 %v805_v46 }
  0x4f   :  { %808 = vmatpush3.bf16.msra.mxu0 %v805_v46 }
  0x50   :  { %810 = vmatprep.subr.bf16.mxu0 %v809_v49 }
  0x53   :  { %812 = vmatpush3.bf16.msra.mxu0 %v809_v49 }
  0x54   :  { %814 = vmatprep.subr.bf16.mxu0 %v813_v52 }
  0x57   :  { %816 = vmatpush3.bf16.msra.mxu0 %v813_v52 }
  0x5a   :  { %713 = vmatmul.mubr.msk.f32.vlgmr.msra.gmra.mrb[0].mxu0 %vm81_vm0, %v599_v53 }
 0x12d   :  { %v714_v1 = vpop.f32.mrb[0].mxu0 }
 0x12e   :  { %v1101_v2 = vadd.f32 %v714_v1, %v339_v0  ;;  %v325_v3 = vpop.f32.mrb[1].mxu0 }
 0x12f   :  { %v340_v4 = vadd.f32 %v339_v0, %v325_v3 }
 0x130   :  { %v343_v8 = vmax.f32 %v1101_v2, 0.0 }
 0x131   :  { %v342_v7 = vmax.f32 %v340_v4, 0.0 }
 0x133   :  { %731 = vmatprep.mubr.msk.f32.mxu1 %vm81_vm0, %v342_v7 }
 0x134   :  { %732 = vmatmul.mubr.msk.f32.vlgmr.msra.gmra.mrb[0].mxu1 %vm81_vm0, %v343_v8 }
 0x135   :  { %836 = vmatpush3.bf16.msra.mxu1 %v833_v59 }
 0x136   :  { %838 = vmatprep.subr.bf16.mxu1 %v837_v9 }
 0x139   :  { %840 = vmatpush3.bf16.msra.mxu1 %v837_v9 }
 0x13a   :  { %842 = vmatprep.subr.bf16.mxu1 %v841_v12 }
 0x13d   :  { %844 = vmatpush3.bf16.msra.mxu1 %v841_v12 }
 0x13e   :  { %846 = vmatprep.subr.bf16.mxu1 %v845_v15 }
 0x141   :  { %848 = vmatpush3.bf16.msra.mxu1 %v845_v15 }
 0x142   :  { %850 = vmatprep.subr.bf16.mxu1 %v849_v18 }
 0x145   :  { %852 = vmatpush3.bf16.msra.mxu1 %v849_v18 }
 0x146   :  { %854 = vmatprep.subr.bf16.mxu1 %v853_v21 }
 0x149   :  { %856 = vmatpush3.bf16.msra.mxu1 %v853_v21 }
 0x14a   :  { %858 = vmatprep.subr.bf16.mxu1 %v857_v24 }
 0x14d   :  { %860 = vmatpush3.bf16.msra.mxu1 %v857_v24 }
 0x14e   :  { %862 = vmatprep.subr.bf16.mxu1 %v861_v27 }
 0x151   :  { %864 = vmatpush3.bf16.msra.mxu1 %v861_v27 }
 0x207   :  { %v733_v30 = vpop.f32.mrb[0].mxu1 }
 0x208   :  { %v434_v31 = vadd.f32 %v733_v30, %v355_v29  ;;  %v428_v32 = vpop.f32.mrb[1].mxu1 }
 0x209   :  { %v429_v33 = vadd.f32 %v428_v32, %v355_v29 }
 0x20a   :  { %v438_v35 = vmax.f32 %v434_v31, 0.0 }
 0x20b   :  { %v437_v34 = vmax.f32 %v429_v33, 0.0 }
 0x20d   :  { %766 = vmatprep.mubr.f32.mxu1 %v437_v34 }
 0x20e   :  { %767 = vmatmul.mubr.f32.vlgmr.msra.gmra.mrb[2].mxu1 %v438_v35 }
 0x2e1   :  { %v768_v38 = vpop.f32.mrb[2].mxu1 }
 0x2e2   :  { %v525_v39 = vpop.f32.mrb[3].mxu1  ;;  %v531_v41 = vadd.f32 %v768_v38, %v458_v37 }
 0x2e3   :  { %v526_v40 = vadd.f32 %v525_v39, %v458_v37 }
 0x2e5   :  { %536 = vrot.lane.b32.xlu0 %v526_v40, %s949_s28 }
 0x2e9   :  { %538 = vrot.lane.b32.xlu0 %v531_v41, %s949_s28 }
 0x357   :  { %v537_v42 = vpop.permute.xlu0 %536 }
 0x358   :  { %v542_v43 = vsel %vm81_vm0, %v342_v7, %v537_v42 }
 0x359   :  { %544 = vst [vmem:[#allocation7] sm:$0xff] %v542_v43 }
 0x35b   :  { %v539_v44 = vpop.permute.xlu0 %538 }
 0x35c   :  { %v543_v45 = vsel %vm81_vm0, %v343_v8, %v539_v44 }
 0x35d   :  { %545 = vst [vmem:[#allocation7 + $0x8] sm:$0xff] %v543_v45 }
 0x35e   :  { %931 = shalt.err (!%p928_p6)
}
 0x35f   :  { %s932_s29 = scalar_lea.hbm %s1176_s5, 256 }
 0x360   :  { %p933_p7 = scmp.ne.s32.totalorder %s1176_s5, %s932_s29  ;;  %p936_p8 = scmp.lt.u32.totalorder %s932_s29, %s1176_s5 }
 0x362   :  { %p938_p9 = pnand %p936_p8, %p933_p7 }
 0x364   :  { %941 = shalt.err (!%p938_p9)
}
 0x365   :  { %557 = dma.vmem_to_hbm [thread:$0]  %s552_s27, 256, %s1176_s5, [#allocation4], %s952_s0, %s952_s0, %s953_s17  }
 0x366   :  { %946 = dma.done.wait [#allocation4], 256  }
 0x367   :  { %947 = vsyncadd [#allocation4], 4294967040 }
 0x368   :  { %561 = vsyncpa [#allocation3], 1 }
 0x369   :  { %562 = vsyncpa [#allocation6], 1 }
 0x36a   :  { %563 = vsyncpa [#allocation4], 1 }

</bundles_post_ra>
